<compile_context>
chip_gen: v7x
topology: tpu7x:2x2x1
jax: 0.10.0
libtpu: 0.0.40
codegen_flags: <defaults>
</compile_context>

<pallas_src>
import functools

import jax
import jax.numpy as jnp
from jax.experimental import pallas as pl
from jax.experimental.pallas import tpu as pltpu

HIDDEN_DIM = 128
INPUT_DIM = 10
NUM_LAYERS = 2      # hard-wired: two stacked tanh RNN layers (matches module)
OUTPUT_DIM = 10
SEQ_LENGTH = 5
BATCH = 1
PAD_OUT = 128       # fc output padded to a full lane width -> unmasked stores
SUBLANE = 8         # f32 sublane tile


def rnn_kernel(x_ref, wih0_ref, whh0_ref, b0_ref,
               w1_ref, b1_ref, wfc_ref, bfc_ref, out_ref,
               *, seq_len, batch, chain_dtype):
    """Forward pass for `batch` sequences stacked along M.

    x_ref is time-major: row (t*batch + b) holds x[b, t, :].
    """
    x = x_ref[...]            # (T*BM, D) f32
    wih0 = wih0_ref[...]      # (D, H)
    whh0 = whh0_ref[...]      # (H, H)
    b0 = b0_ref[...]          # (1, H)        (= b_ih0 + b_hh0)
    w1 = w1_ref[...]          # (2H, H)       (= [W_ih1.T ; W_hh1.T])
    b1 = b1_ref[...]          # (1, H)        (= b_ih1 + b_hh1)
    wfc = wfc_ref[...]        # (H, PAD_OUT)  zero-padded beyond OUTPUT_DIM
    bfc = bfc_ref[...]        # (1, PAD_OUT)

    H = whh0.shape[0]

    # Layer-0 input projection for ALL (t, b) at once: one (T*BM,D)x(D,H)
    # matmul hoisted off the serial chain; its bias folded in here too.
    x_proj = jnp.dot(x, wih0, preferred_element_type=jnp.float32) + b0

    # Pre-split the per-step row blocks (static, sublane-aligned extracts).
    x_rows = [x_proj[t * batch:(t + 1) * batch, :] for t in range(seq_len)]

    # Cast the on-chain weights once (no-op when chain_dtype == f32).
    whh0_c = whh0.astype(chain_dtype)
    w1_c = w1.astype(chain_dtype)
    wih1_c = w1_c[:H, :]       # layer-1 input half, used only at t == 0

    # t = 0: both hidden states start at zero, so the recurrent dots vanish
    # exactly (0 @ W == 0) -> one fewer layer-0 matmul, K=128 layer-1 matmul.
    h0 = jnp.tanh(x_rows[0])                                            # (BM,H)
    h1 = jnp.tanh(
        jnp.dot(h0.astype(chain_dtype), wih1_c,
                preferred_element_type=jnp.float32) + b1)

    # Remaining steps: fully unrolled (T tiny & static) so the scheduler can
    # overlap layer-0 tanh (EUP) with the layer-1 matmul (MXU) across steps.
    # NOTE: b1 stays as one dependent VALU add per step; folding it into the
    # MXU accumulator init would require explicit matmul_push_rhs/pop driving,
    # which we deliberately avoid (see header).
    for t in range(1, seq_len):
        h0 = jnp.tanh(
            jnp.dot(h0.astype(chain_dtype), whh0_c,
                    preferred_element_type=jnp.float32) + x_rows[t])
        # Layer 1: one fused K=2H matmul   [h0 | h1] @ [W_ih1.T ; W_hh1.T].
        h1 = jnp.tanh(
            jnp.dot(jnp.concatenate([h0, h1], axis=1).astype(chain_dtype),
                    w1_c, preferred_element_type=jnp.float32) + b1)

    # Final Linear on the last timestep's top-layer state (lane-padded to 128).
    out_ref[...] = jnp.dot(h1, wfc, preferred_element_type=jnp.float32) + bfc


def rnn_forward(x, params, *, chain_dtype=jnp.float32):
    """x: (B, T, D) float32.  Any B is handled in one pallas_call by stacking
    the sequences along the M dimension of every matmul (B padded to 8)."""
    B, T, D = x.shape
    BM = max(SUBLANE, ((B + SUBLANE - 1) // SUBLANE) * SUBLANE)

    # Pad batch to a sublane multiple and go time-major: row (t*BM + b).
    x_pad = jnp.zeros((BM, T, D), jnp.float32).at[:B].set(x)
    x_tm = x_pad.transpose(1, 0, 2).reshape(T * BM, D)

    args = (x_tm,
            params["wih0"], params["whh0"], params["b0"],
            params["w1"], params["b1"],
            params["wfc_p"], params["bfc_p"])
    vmem = pl.BlockSpec(memory_space=pltpu.MemorySpace.VMEM)

    kernel = functools.partial(rnn_kernel, seq_len=T, batch=BM,
                               chain_dtype=chain_dtype)
    out_pad = pl.pallas_call(
        kernel,
        out_shape=jax.ShapeDtypeStruct((BM, PAD_OUT), jnp.float32),
        in_specs=[vmem] * len(args),
        out_specs=vmem,
    )(*args)
    return out_pad[:B, :OUTPUT_DIM]


def init_params(key):
    """PyTorch-shaped init (W_ih_l0 (H,D), W_hh (H,H), biases (H,), fc (O,H))
    following nn.RNN's convention  h' = tanh(x W_ih^T + b_ih + h W_hh^T + b_hh),
    then packed for the kernel: transposed weights, per-layer biases summed,
    layer-1 weights concatenated along K, fc padded to 128 output lanes."""
    ks = jax.random.split(key, 10)
    s = 1.0 / (HIDDEN_DIM ** 0.5)

    def u(k, shape):
        return jax.random.uniform(k, shape, jnp.float32, -s, s)

    w_ih0 = u(ks[0], (HIDDEN_DIM, INPUT_DIM))
    w_hh0 = u(ks[1], (HIDDEN_DIM, HIDDEN_DIM))
    b_ih0 = u(ks[2], (HIDDEN_DIM,))
    b_hh0 = u(ks[3], (HIDDEN_DIM,))
    w_ih1 = u(ks[4], (HIDDEN_DIM, HIDDEN_DIM))
    w_hh1 = u(ks[5], (HIDDEN_DIM, HIDDEN_DIM))
    b_ih1 = u(ks[6], (HIDDEN_DIM,))
    b_hh1 = u(ks[7], (HIDDEN_DIM,))
    w_fc = u(ks[8], (OUTPUT_DIM, HIDDEN_DIM))
    b_fc = u(ks[9], (OUTPUT_DIM,))

    wfc_t = w_fc.T                                                  # (H, O)
    wfc_p = jnp.zeros((HIDDEN_DIM, PAD_OUT), jnp.float32)
    wfc_p = wfc_p.at[:, :OUTPUT_DIM].set(wfc_t)
    bfc_p = jnp.zeros((1, PAD_OUT), jnp.float32)
    bfc_p = bfc_p.at[:, :OUTPUT_DIM].set(b_fc)

    return {
        "wih0": w_ih0.T,                                            # (D, H)
        "whh0": w_hh0.T,                                            # (H, H)
        "b0":   (b_ih0 + b_hh0).reshape(1, HIDDEN_DIM),
        "w1":   jnp.concatenate([w_ih1.T, w_hh1.T], axis=0),        # (2H, H)
        "b1":   (b_ih1 + b_hh1).reshape(1, HIDDEN_DIM),
        "wfc_p": wfc_p,                                             # (H, 128)
        "bfc_p": bfc_p,                                             # (1, 128)
    }


def rnn_reference(x, p):
    """Pure-JAX reference of the same forward pass (unpacks fused weights)."""
    B = x.shape[0]
    H = HIDDEN_DIM
    h0 = jnp.zeros((B, H), jnp.float32)
    h1 = jnp.zeros((B, H), jnp.float32)
    wih1, whh1 = p["w1"][:H], p["w1"][H:]
    wfc = p["wfc_p"][:, :OUTPUT_DIM]
    bfc = p["bfc_p"][:, :OUTPUT_DIM]
    for t in range(x.shape[1]):
        x_t = x[:, t, :]
        h0 = jnp.tanh(x_t @ p["wih0"] + h0 @ p["whh0"] + p["b0"])
        h1 = jnp.tanh(h0 @ wih1 + h1 @ whh1 + p["b1"])
    return h1 @ wfc + bfc


if __name__ == "__main__":
    key = jax.random.PRNGKey(0)
    k_x, k_p, k_xb = jax.random.split(key, 3)
    params = init_params(k_p)

    # Module spec shape: (1, 5, 10).
    x = jax.random.normal(k_x, (BATCH, SEQ_LENGTH, INPUT_DIM), jnp.float32)
    out = jax.block_until_ready(rnn_forward(x, params))
    ref = rnn_reference(x, params)
    assert out.shape == (BATCH, OUTPUT_DIM)
    assert jnp.allclose(out, ref, atol=1e-4, rtol=1e-4)

    # Batched path: 8 sequences in ONE pallas_call (amortizes launch overhead
    # and the weight DMA; matmuls become (8,128)x(128,128)).
    xb = jax.random.normal(k_xb, (8, SEQ_LENGTH, INPUT_DIM), jnp.float32)
    out_b = jax.block_until_ready(rnn_forward(xb, params))
    ref_b = rnn_reference(xb, params)
    assert out_b.shape == (8, OUTPUT_DIM)
    assert jnp.allclose(out_b, ref_b, atol=1e-4, rtol=1e-4)

    # Optional bf16-on-chain variant (perf review): f32 accumulate / bias /
    # tanh, bf16 dot operands only.  Loosened tolerance — bf16 recurrence
    # rounding (~1e-3/step) cannot meet 1e-4, hence it is not the default.
    out_bf = jax.block_until_ready(
        rnn_forward(xb, params, chain_dtype=jnp.bfloat16))
    assert jnp.allclose(out_bf, ref_b, atol=5e-2, rtol=0.0)

    print("KERNEL_OK")
</pallas_src>

<mosaic_0001>
module attributes {stable_mosaic.version = 11 : i64} {
  func.func @rnn_kernel(%arg0: memref<40x10xf32, #tpu.memory_space<vmem>>, %arg1: memref<10x128xf32, #tpu.memory_space<vmem>>, %arg2: memref<128x128xf32, #tpu.memory_space<vmem>>, %arg3: memref<1x128xf32, #tpu.memory_space<vmem>>, %arg4: memref<256x128xf32, #tpu.memory_space<vmem>>, %arg5: memref<1x128xf32, #tpu.memory_space<vmem>>, %arg6: memref<128x128xf32, #tpu.memory_space<vmem>>, %arg7: memref<1x128xf32, #tpu.memory_space<vmem>>, %arg8: memref<8x128xf32, #tpu.memory_space<vmem>>) attributes {dimension_semantics = [], scalar_prefetch = 0 : i64, scratch_operands = 0 : i64, tpu.core_type = #tpu.core_type<tc>} {
    %c0 = arith.constant 0 : index
    %c0_0 = arith.constant 0 : index
    %0 = vector.load %arg0[%c0, %c0_0] : memref<40x10xf32, #tpu.memory_space<vmem>>, vector<40x10xf32>
    %c0_1 = arith.constant 0 : index
    %c0_2 = arith.constant 0 : index
    %1 = vector.load %arg1[%c0_1, %c0_2] : memref<10x128xf32, #tpu.memory_space<vmem>>, vector<10x128xf32>
    %c0_3 = arith.constant 0 : index
    %c0_4 = arith.constant 0 : index
    %2 = vector.load %arg2[%c0_3, %c0_4] : memref<128x128xf32, #tpu.memory_space<vmem>>, vector<128x128xf32>
    %c0_5 = arith.constant 0 : index
    %c0_6 = arith.constant 0 : index
    %3 = vector.load %arg3[%c0_5, %c0_6] : memref<1x128xf32, #tpu.memory_space<vmem>>, vector<1x128xf32>
    %c0_7 = arith.constant 0 : index
    %c0_8 = arith.constant 0 : index
    %4 = vector.load %arg4[%c0_7, %c0_8] : memref<256x128xf32, #tpu.memory_space<vmem>>, vector<256x128xf32>
    %c0_9 = arith.constant 0 : index
    %c0_10 = arith.constant 0 : index
    %5 = vector.load %arg5[%c0_9, %c0_10] : memref<1x128xf32, #tpu.memory_space<vmem>>, vector<1x128xf32>
    %c0_11 = arith.constant 0 : index
    %c0_12 = arith.constant 0 : index
    %6 = vector.load %arg6[%c0_11, %c0_12] : memref<128x128xf32, #tpu.memory_space<vmem>>, vector<128x128xf32>
    %c0_13 = arith.constant 0 : index
    %c0_14 = arith.constant 0 : index
    %7 = vector.load %arg7[%c0_13, %c0_14] : memref<1x128xf32, #tpu.memory_space<vmem>>, vector<1x128xf32>
    %cst = arith.constant dense<0.000000e+00> : vector<40x128xf32>
    %8 = tpu.matmul %0, %1, %cst {dimension_numbers = #tpu.dot_dimension_numbers<[1], [0], [0], [1], [0, 0, 1, 1], [], []>} : vector<40x10xf32>, vector<10x128xf32>, vector<40x128xf32> -> vector<40x128xf32>
    %9 = vector.broadcast %3 : vector<1x128xf32> to vector<40x128xf32>
    %10 = arith.addf %8, %9 : vector<40x128xf32>
    %11 = vector.extract_strided_slice %10 {offsets = [0, 0], sizes = [8, 128], strides = [1, 1]} : vector<40x128xf32> to vector<8x128xf32>
    %12 = vector.extract_strided_slice %10 {offsets = [8, 0], sizes = [8, 128], strides = [1, 1]} : vector<40x128xf32> to vector<8x128xf32>
    %13 = vector.extract_strided_slice %10 {offsets = [16, 0], sizes = [8, 128], strides = [1, 1]} : vector<40x128xf32> to vector<8x128xf32>
    %14 = vector.extract_strided_slice %10 {offsets = [24, 0], sizes = [8, 128], strides = [1, 1]} : vector<40x128xf32> to vector<8x128xf32>
    %15 = vector.extract_strided_slice %10 {offsets = [32, 0], sizes = [8, 128], strides = [1, 1]} : vector<40x128xf32> to vector<8x128xf32>
    %16 = vector.extract_strided_slice %4 {offsets = [0, 0], sizes = [128, 128], strides = [1, 1]} : vector<256x128xf32> to vector<128x128xf32>
    %17 = math.tanh %11 : vector<8x128xf32>
    %cst_15 = arith.constant dense<0.000000e+00> : vector<8x128xf32>
    %18 = tpu.matmul %17, %16, %cst_15 {dimension_numbers = #tpu.dot_dimension_numbers<[1], [0], [0], [1], [0, 0, 1, 1], [], []>} : vector<8x128xf32>, vector<128x128xf32>, vector<8x128xf32> -> vector<8x128xf32>
    %19 = vector.broadcast %5 : vector<1x128xf32> to vector<8x128xf32>
    %20 = arith.addf %18, %19 : vector<8x128xf32>
    %21 = math.tanh %20 : vector<8x128xf32>
    %cst_16 = arith.constant dense<0.000000e+00> : vector<8x128xf32>
    %22 = tpu.matmul %17, %2, %cst_16 {dimension_numbers = #tpu.dot_dimension_numbers<[1], [0], [0], [1], [0, 0, 1, 1], [], []>} : vector<8x128xf32>, vector<128x128xf32>, vector<8x128xf32> -> vector<8x128xf32>
    %23 = arith.addf %22, %12 : vector<8x128xf32>
    %24 = math.tanh %23 : vector<8x128xf32>
    %25 = tpu.concatenate %24, %21 in 1 : vector<8x128xf32>, vector<8x128xf32> -> vector<8x256xf32>
    %cst_17 = arith.constant dense<0.000000e+00> : vector<8x128xf32>
    %26 = tpu.matmul %25, %4, %cst_17 {dimension_numbers = #tpu.dot_dimension_numbers<[1], [0], [0], [1], [0, 0, 1, 1], [], []>} : vector<8x256xf32>, vector<256x128xf32>, vector<8x128xf32> -> vector<8x128xf32>
    %27 = vector.broadcast %5 : vector<1x128xf32> to vector<8x128xf32>
    %28 = arith.addf %26, %27 : vector<8x128xf32>
    %29 = math.tanh %28 : vector<8x128xf32>
    %cst_18 = arith.constant dense<0.000000e+00> : vector<8x128xf32>
    %30 = tpu.matmul %24, %2, %cst_18 {dimension_numbers = #tpu.dot_dimension_numbers<[1], [0], [0], [1], [0, 0, 1, 1], [], []>} : vector<8x128xf32>, vector<128x128xf32>, vector<8x128xf32> -> vector<8x128xf32>
    %31 = arith.addf %30, %13 : vector<8x128xf32>
    %32 = math.tanh %31 : vector<8x128xf32>
    %33 = tpu.concatenate %32, %29 in 1 : vector<8x128xf32>, vector<8x128xf32> -> vector<8x256xf32>
    %cst_19 = arith.constant dense<0.000000e+00> : vector<8x128xf32>
    %34 = tpu.matmul %33, %4, %cst_19 {dimension_numbers = #tpu.dot_dimension_numbers<[1], [0], [0], [1], [0, 0, 1, 1], [], []>} : vector<8x256xf32>, vector<256x128xf32>, vector<8x128xf32> -> vector<8x128xf32>
    %35 = vector.broadcast %5 : vector<1x128xf32> to vector<8x128xf32>
    %36 = arith.addf %34, %35 : vector<8x128xf32>
    %37 = math.tanh %36 : vector<8x128xf32>
    %cst_20 = arith.constant dense<0.000000e+00> : vector<8x128xf32>
    %38 = tpu.matmul %32, %2, %cst_20 {dimension_numbers = #tpu.dot_dimension_numbers<[1], [0], [0], [1], [0, 0, 1, 1], [], []>} : vector<8x128xf32>, vector<128x128xf32>, vector<8x128xf32> -> vector<8x128xf32>
    %39 = arith.addf %38, %14 : vector<8x128xf32>
    %40 = math.tanh %39 : vector<8x128xf32>
    %41 = tpu.concatenate %40, %37 in 1 : vector<8x128xf32>, vector<8x128xf32> -> vector<8x256xf32>
    %cst_21 = arith.constant dense<0.000000e+00> : vector<8x128xf32>
    %42 = tpu.matmul %41, %4, %cst_21 {dimension_numbers = #tpu.dot_dimension_numbers<[1], [0], [0], [1], [0, 0, 1, 1], [], []>} : vector<8x256xf32>, vector<256x128xf32>, vector<8x128xf32> -> vector<8x128xf32>
    %43 = vector.broadcast %5 : vector<1x128xf32> to vector<8x128xf32>
    %44 = arith.addf %42, %43 : vector<8x128xf32>
    %45 = math.tanh %44 : vector<8x128xf32>
    %cst_22 = arith.constant dense<0.000000e+00> : vector<8x128xf32>
    %46 = tpu.matmul %40, %2, %cst_22 {dimension_numbers = #tpu.dot_dimension_numbers<[1], [0], [0], [1], [0, 0, 1, 1], [], []>} : vector<8x128xf32>, vector<128x128xf32>, vector<8x128xf32> -> vector<8x128xf32>
    %47 = arith.addf %46, %15 : vector<8x128xf32>
    %48 = math.tanh %47 : vector<8x128xf32>
    %49 = tpu.concatenate %48, %45 in 1 : vector<8x128xf32>, vector<8x128xf32> -> vector<8x256xf32>
    %cst_23 = arith.constant dense<0.000000e+00> : vector<8x128xf32>
    %50 = tpu.matmul %49, %4, %cst_23 {dimension_numbers = #tpu.dot_dimension_numbers<[1], [0], [0], [1], [0, 0, 1, 1], [], []>} : vector<8x256xf32>, vector<256x128xf32>, vector<8x128xf32> -> vector<8x128xf32>
    %51 = vector.broadcast %5 : vector<1x128xf32> to vector<8x128xf32>
    %52 = arith.addf %50, %51 : vector<8x128xf32>
    %53 = math.tanh %52 : vector<8x128xf32>
    %cst_24 = arith.constant dense<0.000000e+00> : vector<8x128xf32>
    %54 = tpu.matmul %53, %6, %cst_24 {dimension_numbers = #tpu.dot_dimension_numbers<[1], [0], [0], [1], [0, 0, 1, 1], [], []>} : vector<8x128xf32>, vector<128x128xf32>, vector<8x128xf32> -> vector<8x128xf32>
    %55 = vector.broadcast %7 : vector<1x128xf32> to vector<8x128xf32>
    %56 = arith.addf %54, %55 : vector<8x128xf32>
    %c0_25 = arith.constant 0 : index
    %c0_26 = arith.constant 0 : index
    %57 = vector.load %arg8[%c0_25, %c0_26] : memref<8x128xf32, #tpu.memory_space<vmem>>, vector<8x128xf32>
    tpu.vector_store %arg8[%c0_25, %c0_26], %56 {strides = array<i32>} : memref<8x128xf32, #tpu.memory_space<vmem>>, vector<8x128xf32>,
    return
  }
}

</mosaic_0001>

<bundles_post_ra>
// kernel: tpu_custom_call.1
= control target key start
LH: loop header
LB: loop body
LE: loop exit
PB: predicated region body
PF: predicated region fallthrough
CT: control target
= control target key end

     0   :  { %13 = vsyncpa [#allocation3], 0  ;;  %s2290_s0 = inlined_call_operand.vmem [shape: f32[40,10], index: 0, kind: input, shape index: {}]   ;;  %s2291_s1 = inlined_call_operand.vmem [shape: f32[10,128], index: 1, kind: input, shape index: {}]   ;;  %s2292_s2 = inlined_call_operand.hbm [shape: f32[128,128], index: 2, kind: input, shape index: {}]   ;;  %s2293_s3 = inlined_call_operand.vmem [shape: f32[1,128], index: 3, kind: input, shape index: {}]   ;;  %s2294_s4 = inlined_call_operand.hbm [shape: f32[256,128], index: 4, kind: input, shape index: {}]   ;;  %s2295_s5 = inlined_call_operand.vmem [shape: f32[1,128], index: 5, kind: input, shape index: {}]   ;;  %s2296_s6 = inlined_call_operand.hbm [shape: f32[128,128], index: 6, kind: input, shape index: {}]   ;;  %s2297_s7 = inlined_call_operand.vmem [shape: f32[1,128], index: 7, kind: input, shape index: {}]   ;;  %s2298_s8 = inlined_call_operand.hbm [shape: f32[8,128], index: 8, kind: output, shape index: {}]  }
   0x1   :  { %14 = vsyncpa [#allocation6], 0 }
   0x2   :  { %15 = vsyncpa [#allocation4], 0  ;;  %s1899_s27 = smov [#allocation5]   ;;  %s1900_s29 = smov [#allocation2]  }
   0x3   :  { %s39_s28 = sshll.u32 %s1899_s27, 4  ;;  %s25_s30 = sshll.u32 %s1900_s29, 4  ;;  %s40_s28 = int_to_ptr.vmem [resolvable:$true] %s39_s28  ;;  %s1954_s30 = int_to_ptr.vmem [resolvable:$true] %s25_s30 }
   0x4   :  { %s1805_s11 = scalar_lea.hbm %s2294_s4, 4096 }
   0x5   :  { %p1806_p0 = scmp.ne.s32.totalorder %s2294_s4, %s1805_s11  ;;  %p1809_p1 = scmp.lt.u32.totalorder %s1805_s11, %s2294_s4 }
   0x7   :  { %p1811_p2 = pnand %p1809_p1, %p1806_p0 }
   0x9   :  { %1814 = shalt.err (!%p1811_p2)
}
   0xa   :  { %s1815_s16 = scalar_lea.vmem %s40_s28, 4096  ;;  %p1820_p4 = scmp.lt.s32.totalorder %s40_s28, %s40_s28 }
   0xb   :  { %p1816_p3 = scmp.ne.s32.totalorder %s40_s28, %s1815_s16  ;;  %p1821_p5 = scmp.lt.s32.totalorder %s1815_s16, %s1815_s16 }
   0xd   :  { %p1822_p6 = por %p1821_p5, %p1820_p4 }
   0xf   :  { %p1823_p7 = pnand %p1822_p6, %p1816_p3 }
  0x11   :  { %1826 = shalt.err (!%p1823_p7)
}
  0x12   :  { %s1901_s17 = smov 128   ;;  %s1902_s18 = smov 8  }
  0x13   :  { %45 = dma.hbm_to_vmem [thread:$0]  %s2294_s4, 4096, %s40_s28, [#allocation6], %s1901_s17, %s1901_s17, %s1902_s18  }
  0x14   :  { %s1827_s23 = scalar_lea.hbm %s2292_s2, 2048 }
  0x15   :  { %p1828_p8 = scmp.ne.s32.totalorder %s2292_s2, %s1827_s23  ;;  %p1831_p9 = scmp.lt.u32.totalorder %s1827_s23, %s2292_s2 }
  0x17   :  { %p1833_p10 = pnand %p1831_p9, %p1828_p8 }
  0x19   :  { %1836 = shalt.err (!%p1833_p10)
}
  0x1a   :  { %s1837_s29 = scalar_lea.vmem %s1954_s30, 2048  ;;  %p1842_p12 = scmp.lt.s32.totalorder %s1954_s30, %s1954_s30 }
  0x1b   :  { %p1838_p11 = scmp.ne.s32.totalorder %s1954_s30, %s1837_s29  ;;  %p1843_p13 = scmp.lt.s32.totalorder %s1837_s29, %s1837_s29 }
  0x1d   :  { %p1844_p0 = por %p1843_p13, %p1842_p12 }
  0x1f   :  { %p1845_p1 = pnand %p1844_p0, %p1838_p11 }
  0x21   :  { %1848 = shalt.err (!%p1845_p1)
}
  0x22   :  { %31 = dma.hbm_to_vmem [thread:$0]  %s2292_s2, 2048, %s1954_s30, [#allocation3], %s1901_s17, %s1901_s17, %s1902_s18  }
  0x23   :  { %s1903_s9 = smov [#allocation7]   ;;  %s1849_s13 = scalar_lea.hbm %s2296_s6, 2048 }
  0x24   :  { %s53_s10 = sshll.u32 %s1903_s9, 4  ;;  %p1850_p2 = scmp.ne.s32.totalorder %s2296_s6, %s1849_s13  ;;  %s54_s10 = int_to_ptr.vmem [resolvable:$true] %s53_s10 }
  0x25   :  { %p1853_p3 = scmp.lt.u32.totalorder %s1849_s13, %s2296_s6 }
  0x27   :  { %p1855_p4 = pnand %p1853_p3, %p1850_p2 }
  0x29   :  { %1858 = shalt.err (!%p1855_p4)
}
  0x2a   :  { %s1859_s20 = scalar_lea.vmem %s54_s10, 2048  ;;  %p1864_p6 = scmp.lt.s32.totalorder %s54_s10, %s54_s10 }
  0x2b   :  { %p1860_p5 = scmp.ne.s32.totalorder %s54_s10, %s1859_s20  ;;  %p1865_p7 = scmp.lt.s32.totalorder %s1859_s20, %s1859_s20 }
  0x2d   :  { %p1866_p8 = por %p1865_p7, %p1864_p6 }
  0x2f   :  { %p1867_p9 = pnand %p1866_p8, %p1860_p5 }
  0x31   :  { %1870 = shalt.err (!%p1867_p9)
}
  0x32   :  { %59 = dma.hbm_to_vmem [thread:$0]  %s2296_s6, 2048, %s54_s10, [#allocation6], %s1901_s17, %s1901_s17, %s1902_s18  }
  0x33   :  { %1893 = dma.done.wait [#allocation3], 2048  }
  0x34   :  { %1894 = vsyncadd [#allocation3], 4294965248 }
  0x35   :  { %1895 = dma.done.wait [#allocation6], 6144  }
  0x36   :  { %1896 = vsyncadd [#allocation6], 4294961152  ;;  %v1904_v0 = vmov 0.0|0.0   ;;  %vm1905_vm0 = vmmov 0   ;;  %v1906_v1 = vmov 0.0   ;;  %vm167_vm1 = vcmask 1041408  }
  0x37   :  { %1487 = vmatprep.subr.bf16.mxu0 %v1904_v0  ;;  %1491 = vmatprep.subr.bf16.mxu1 %v1904_v0  ;;  %v76_v2 = vld [vmem:[%s2291_s1] sm:$0xff]  ;;  %v77_v3 = vld [vmem:[%s2291_s1 + $0x8] sm:$0x3]  ;;  %vm1907_vm2 = vmmov 1   ;;  %v97_v10 = vld [vmem:[#allocation5 + $0x10] sm:$0xff]  ;;  %vm151_vm4 = vcmask 80896  }
  0x38   :  { %1262 = vmatprep.mubr.msk.f32.mxu0 %vm1905_vm0, %v1906_v1  ;;  %1309 = vmatprep.mubr.msk.f32.mxu1 %vm1905_vm0, %v1906_v1  ;;  %vm1489_vm3 = vmpackc.low %vm167_vm1, %vm1907_vm2  ;;  %v1488_v4 = vpack.c.bf16 %v77_v3, %v76_v2  ;;  %v95_v5 = vld [vmem:[#allocation5] sm:$0xff]  ;;  %v96_v6 = vld [vmem:[#allocation5 + $0x8] sm:$0xff]  ;;  %s1908_s12 = smov [#allocation8]  }
  0x39   :  { %v78_v7 = vld [vmem:[#allocation2] sm:$0xff]  ;;  %v2018_v8 = vpack.c.bf16 %v96_v6, %v95_v5  ;;  %v79_v9 = vld [vmem:[#allocation2 + $0x8] sm:$0xff]  ;;  %v98_v11 = vld [vmem:[#allocation5 + $0x18] sm:$0xff]  ;;  %s990_s13 = sshll.u32 %s1908_s12, 4  ;;  %s991_s13 = int_to_ptr.vmem [resolvable:$true] %s990_s13 }
  0x3a   :  { %1490 = vmatpush3.bf16.msk.msra.mxu0 %vm1489_vm3, %v1488_v4  ;;  %v71_v12 = vld [vmem:[%s2290_s0] sm:$0xff]  ;;  %v2023_v13 = vpack.c.bf16 %v79_v9, %v78_v7  ;;  %v2027_v14 = vpack.c.bf16 %v98_v11, %v97_v10  ;;  %v80_v15 = vld [vmem:[#allocation2 + $0x10] sm:$0xff]  ;;  %v81_v16 = vld [vmem:[#allocation2 + $0x18] sm:$0xff]  ;;  %s1871_s14 = scalar_lea.vmem %s991_s13, 128  ;;  %p1876_p11 = scmp.lt.s32.totalorder %s991_s13, %s991_s13 }
  0x3b   :  { %1515 = vmatprep.subr.bf16.mxu0 %v1904_v0  ;;  %1493 = vmatpush3.bf16.msra.mxu1 %v2018_v8  ;;  %v99_v17 = vld [vmem:[#allocation5 + $0x20] sm:$0xff]  ;;  %v100_v18 = vld [vmem:[#allocation5 + $0x28] sm:$0xff]  ;;  %v2032_v19 = vpack.c.bf16 %v81_v16, %v80_v15  ;;  %v101_v24 = vld [vmem:[#allocation5 + $0x30] sm:$0xff]  ;;  %p1872_p10 = scmp.ne.s32.totalorder %s991_s13, %s1871_s14  ;;  %p1877_p12 = scmp.lt.s32.totalorder %s1871_s14, %s1871_s14 }
  0x3c   :  { %1494 = vmatprep.subr.bf16.mxu1 %v1904_v0  ;;  %v72_v20 = vld [vmem:[%s2290_s0 + $0x8] sm:$0xff]  ;;  %v2041_v21 = vpack.c.bf16 %v100_v18, %v99_v17  ;;  %v82_v22 = vld [vmem:[#allocation2 + $0x20] sm:$0xff]  ;;  %v102_v25 = vld [vmem:[#allocation5 + $0x38] sm:$0xff] }
  0x3d   :  { %1263 = vmatmul.mubr.msk.f32.vlgmr.msra.gmra.mrb[0].mxu0 %vm151_vm4, %v71_v12  ;;  %v83_v23 = vld [vmem:[#allocation2 + $0x28] sm:$0xff]  ;;  %v2052_v27 = vpack.c.bf16 %v102_v25, %v101_v24  ;;  %v84_v28 = vld [vmem:[#allocation2 + $0x30] sm:$0xff]  ;;  %v85_v29 = vld [vmem:[#allocation2 + $0x38] sm:$0xff]  ;;  %p1878_p13 = por %p1877_p12, %p1876_p11 }
  0x3e   :  { %1517 = vmatpush3.bf16.msra.mxu0 %v2023_v13  ;;  %1265 = vmatprep.mubr.msk.f32.mxu0 %vm1905_vm0, %v1906_v1  ;;  %v2046_v26 = vpack.c.bf16 %v83_v23, %v82_v22  ;;  %v103_v30 = vld [vmem:[#allocation5 + $0x40] sm:$0xff]  ;;  %v104_v31 = vld [vmem:[#allocation5 + $0x48] sm:$0xff]  ;;  %v2056_v32 = vpack.c.bf16 %v85_v29, %v84_v28  ;;  %v105_v37 = vld [vmem:[#allocation5 + $0x50] sm:$0xff] }
  0x3f   :  { %1518 = vmatprep.subr.bf16.mxu0 %v1904_v0  ;;  %1496 = vmatpush3.bf16.msra.mxu1 %v2027_v14  ;;  %v2060_v33 = vpack.c.bf16 %v104_v31, %v103_v30  ;;  %v86_v34 = vld [vmem:[#allocation2 + $0x40] sm:$0xff]  ;;  %v87_v35 = vld [vmem:[#allocation2 + $0x48] sm:$0xff]  ;;  %v106_v38 = vld [vmem:[#allocation5 + $0x58] sm:$0xff]  ;;  %p1879_p0 = pnand %p1878_p13, %p1872_p10 }
  0x40   :  { %1497 = vmatprep.subr.bf16.mxu1 %v1904_v0  ;;  %v2064_v36 = vpack.c.bf16 %v87_v35, %v86_v34  ;;  %v88_v39 = vld [vmem:[#allocation2 + $0x50] sm:$0xff]  ;;  %v2074_v41 = vpack.c.bf16 %v106_v38, %v105_v37  ;;  %v89_v42 = vld [vmem:[#allocation2 + $0x58] sm:$0xff]  ;;  %v107_v45 = vld [vmem:[#allocation5 + $0x60] sm:$0xff] }
  0x41   :  { %1266 = vmatmul.mubr.msk.f32.gmra.mrb[2].mxu0 %vm151_vm4, %v72_v20  ;;  %v73_v40 = vld [vmem:[%s2290_s0 + $0x10] sm:$0xff]  ;;  %v2077_v43 = vpack.c.bf16 %v89_v42, %v88_v39  ;;  %v74_v44 = vld [vmem:[%s2290_s0 + $0x18] sm:$0xff]  ;;  %v108_v46 = vld [vmem:[#allocation5 + $0x68] sm:$0xff] }
  0x42   :  { %1520 = vmatpush3.bf16.msra.mxu0 %v2032_v19  ;;  %1268 = vmatprep.mubr.msk.f32.mxu0 %vm1905_vm0, %v1906_v1  ;;  %v2087_v47 = vpack.c.bf16 %v108_v46, %v107_v45  ;;  %v90_v48 = vld [vmem:[#allocation2 + $0x60] sm:$0xff]  ;;  %v91_v49 = vld [vmem:[#allocation2 + $0x68] sm:$0xff]  ;;  %v109_v51 = vld [vmem:[#allocation5 + $0x70] sm:$0xff] }
  0x43   :  { %1521 = vmatprep.subr.bf16.mxu0 %v1904_v0  ;;  %1499 = vmatpush3.bf16.msra.mxu1 %v2041_v21  ;;  %v2090_v50 = vpack.c.bf16 %v91_v49, %v90_v48  ;;  %v110_v52 = vld [vmem:[#allocation5 + $0x78] sm:$0xff]  ;;  %v92_v53 = vld [vmem:[#allocation2 + $0x70] sm:$0xff]  ;;  %v75_v55 = vld [vmem:[%s2290_s0 + $0x20] sm:$0xff] }
  0x44   :  { %1500 = vmatprep.subr.bf16.mxu1 %v1904_v0  ;;  %v93_v54 = vld [vmem:[#allocation2 + $0x78] sm:$0xff]  ;;  %v2099_v56 = vpack.c.bf16 %v110_v52, %v109_v51  ;;  %v111_v58 = vld [vmem:[#allocation5 + $0x80] sm:$0xff]  ;;  %v112_v59 = vld [vmem:[#allocation5 + $0x88] sm:$0xff] }
  0x45   :  { %1269 = vmatmul.mubr.msk.f32.gmra.mrb[4].mxu0 %vm151_vm4, %v73_v40  ;;  %v2103_v57 = vpack.c.bf16 %v93_v54, %v92_v53  ;;  %v2112_v60 = vpack.c.bf16 %v112_v59, %v111_v58  ;;  %v2118_v61 = vld [vmem:[%s2293_s3] ss:$0 sm:$0xff]  ;;  %v113_v3 = vld [vmem:[#allocation5 + $0x90] sm:$0xff]  ;;  %v114_v4 = vld [vmem:[#allocation5 + $0x98] sm:$0xff] }
  0x46   :  { %1523 = vmatpush3.bf16.msra.mxu0 %v2046_v26  ;;  %1271 = vmatprep.mubr.msk.f32.mxu0 %vm1905_vm0, %v1906_v1  ;;  %v2121_v5 = vpack.c.bf16 %v114_v4, %v113_v3  ;;  %v115_v7 = vld [vmem:[#allocation5 + $0xa0] sm:$0xff]  ;;  %v116_v9 = vld [vmem:[#allocation5 + $0xa8] sm:$0xff]  ;;  %v117_v11 = vld [vmem:[#allocation5 + $0xb0] sm:$0xff] }
  0x47   :  { %1524 = vmatprep.subr.bf16.mxu0 %v1904_v0  ;;  %1502 = vmatpush3.bf16.msra.mxu1 %v2052_v27  ;;  %v2127_v10 = vpack.c.bf16 %v116_v9, %v115_v7  ;;  %v118_v12 = vld [vmem:[#allocation5 + $0xb8] sm:$0xff]  ;;  %v119_v16 = vld [vmem:[#allocation5 + $0xc0] sm:$0xff]  ;;  %v120_v17 = vld [vmem:[#allocation5 + $0xc8] sm:$0xff] }
  0x48   :  { %1503 = vmatprep.subr.bf16.mxu1 %v1904_v0  ;;  %v2135_v15 = vpack.c.bf16 %v118_v12, %v117_v11  ;;  %v2141_v18 = vpack.c.bf16 %v120_v17, %v119_v16  ;;  %v121_v20 = vld [vmem:[#allocation5 + $0xd0] sm:$0xff]  ;;  %v122_v22 = vld [vmem:[#allocation5 + $0xd8] sm:$0xff]  ;;  %v123_v24 = vld [vmem:[#allocation5 + $0xe0] sm:$0xff] }
  0x49   :  { %1272 = vmatmul.mubr.msk.f32.gmra.mrb[6].mxu0 %vm151_vm4, %v74_v44  ;;  %v2156_v23 = vpack.c.bf16 %v122_v22, %v121_v20  ;;  %v124_v25 = vld [vmem:[#allocation5 + $0xe8] sm:$0xff]  ;;  %v125_v28 = vld [vmem:[#allocation5 + $0xf0] sm:$0xff]  ;;  %v126_v30 = vld [vmem:[#allocation5 + $0xf8] sm:$0xff] }
  0x4a   :  { %1526 = vmatpush3.bf16.msra.mxu0 %v2056_v32  ;;  %1274 = vmatprep.mubr.msk.f32.mxu0 %vm1905_vm0, %v1906_v1  ;;  %v2160_v29 = vpack.c.bf16 %v124_v25, %v123_v24  ;;  %v2162_v31 = vpack.c.bf16 %v126_v30, %v125_v28  ;;  %v2172_v34 = vld [vmem:[%s2295_s5] ss:$0 sm:$0xff]  ;;  %v138_v17 = vld [vmem:[#allocation7 + $0x50] sm:$0xff]  ;;  %v143_v25 = vld [vmem:[#allocation7 + $0x78] sm:$0xff] }
  0x4b   :  { %1527 = vmatprep.subr.bf16.mxu0 %v1904_v0  ;;  %1505 = vmatpush3.bf16.msra.mxu1 %v2060_v33  ;;  %v136_v12 = vld [vmem:[#allocation7 + $0x40] sm:$0xff]  ;;  %v142_v24 = vld [vmem:[#allocation7 + $0x70] sm:$0xff] }
  0x4c   :  { %1506 = vmatprep.subr.bf16.mxu1 %v1904_v0  ;;  %v140_v22 = vld [vmem:[#allocation7 + $0x60] sm:$0xff]  ;;  %v1761_v28 = vpack.c.bf16 %v143_v25, %v142_v24 }
  0x4d   :  { %1275 = vmatmul.mubr.msk.f32.gmra.mrb[8].mxu0 %vm151_vm4, %v75_v55 }
  0x4e   :  { %1529 = vmatpush3.bf16.msra.mxu0 %v2064_v36  ;;  %1344 = vmatprep.mubr.msk.f32.mxu0 %vm1905_vm0, %v1906_v1 }
  0x4f   :  { %1530 = vmatprep.subr.bf16.mxu0 %v1904_v0  ;;  %1508 = vmatpush3.bf16.msra.mxu1 %v2074_v41 }
  0x50   :  { %1509 = vmatprep.subr.bf16.mxu1 %v1904_v0 }
  0x52   :  { %1532 = vmatpush3.bf16.msra.mxu0 %v2077_v43 }
  0x53   :  { %1533 = vmatprep.subr.bf16.mxu0 %v1904_v0  ;;  %1511 = vmatpush3.bf16.msra.mxu1 %v2087_v47 }
  0x54   :  { %1512 = vmatprep.subr.bf16.mxu1 %v1904_v0 }
  0x56   :  { %1535 = vmatpush3.bf16.msra.mxu0 %v2090_v50 }
  0x57   :  { %1536 = vmatprep.subr.bf16.mxu0 %v1904_v0  ;;  %1514 = vmatpush3.bf16.msra.mxu1 %v2099_v56 }
  0x58   :  { %1540 = vmatprep.subr.bf16.mxu1 %v2112_v60 }
  0x5a   :  { %1538 = vmatpush3.bf16.msra.mxu0 %v2103_v57 }
  0x5b   :  { %1571 = vmatprep.subr.bf16.mxu0 %v1904_v0 }
 0x110   :  { %v237_v62 = vpop.f32.mrb[0].mxu0 }
 0x111   :  { %v238_v63 = vadd.f32 %v2118_v61, %v237_v62  ;;  %v1264_v2 = vpop.f32.mrb[1].mxu0  ;;  %v133_v62 = vld [vmem:[#allocation7 + $0x28] sm:$0xff] }
 0x113   :  { %1785 = vtanh.f32 %v238_v63  ;;  %v135_v63 = vld [vmem:[#allocation7 + $0x38] sm:$0xff] }
 0x11d   :  { %v1786_v6 = vpop.eup %1785 }
 0x11e   :  { %1310 = vmatmul.mubr.f32.vlgmr.msra.gmra.mrb[0].mxu1 %v1786_v6  ;;  %1345 = vmatmul.mubr.f32.vlgmr.msra.gmra.mrb[2].mxu0 %v1786_v6 }
 0x11f   :  { %1573 = vmatpush3.bf16.msra.mxu0 %v2023_v13  ;;  %1542 = vmatpush3.bf16.msra.mxu1 %v2018_v8 }
 0x120   :  { %1574 = vmatprep.subr.bf16.mxu0 %v1904_v0  ;;  %1544 = vmatprep.subr.bf16.mxu1 %v2121_v5 }
 0x121   :  { %1379 = vmatprep.mubr.msk.f32.mxu0 %vm1905_vm0, %v1906_v1 }
 0x123   :  { %1576 = vmatpush3.bf16.msra.mxu0 %v2032_v19  ;;  %1546 = vmatpush3.bf16.msra.mxu1 %v2027_v14 }
 0x124   :  { %1577 = vmatprep.subr.bf16.mxu0 %v1904_v0  ;;  %1548 = vmatprep.subr.bf16.mxu1 %v2127_v10 }
 0x127   :  { %1579 = vmatpush3.bf16.msra.mxu0 %v2046_v26  ;;  %1550 = vmatpush3.bf16.msra.mxu1 %v2041_v21 }
 0x128   :  { %1580 = vmatprep.subr.bf16.mxu0 %v1904_v0  ;;  %1552 = vmatprep.subr.bf16.mxu1 %v2135_v15 }
 0x12b   :  { %1582 = vmatpush3.bf16.msra.mxu0 %v2056_v32  ;;  %1554 = vmatpush3.bf16.msra.mxu1 %v2052_v27 }
 0x12c   :  { %1583 = vmatprep.subr.bf16.mxu0 %v1904_v0  ;;  %1556 = vmatprep.subr.bf16.mxu1 %v2141_v18 }
 0x12f   :  { %1585 = vmatpush3.bf16.msra.mxu0 %v2064_v36  ;;  %1558 = vmatpush3.bf16.msra.mxu1 %v2060_v33 }
 0x130   :  { %1586 = vmatprep.subr.bf16.mxu0 %v1904_v0  ;;  %1560 = vmatprep.subr.bf16.mxu1 %v2156_v23 }
 0x133   :  { %1588 = vmatpush3.bf16.msra.mxu0 %v2077_v43  ;;  %1562 = vmatpush3.bf16.msra.mxu1 %v2074_v41 }
 0x134   :  { %1589 = vmatprep.subr.bf16.mxu0 %v1904_v0  ;;  %1564 = vmatprep.subr.bf16.mxu1 %v2160_v29 }
 0x137   :  { %1591 = vmatpush3.bf16.msra.mxu0 %v2090_v50  ;;  %1566 = vmatpush3.bf16.msra.mxu1 %v2087_v47 }
 0x138   :  { %1592 = vmatprep.subr.bf16.mxu0 %v1904_v0  ;;  %1568 = vmatprep.subr.bf16.mxu1 %v2162_v31 }
 0x13b   :  { %1594 = vmatpush3.bf16.msra.mxu0 %v2103_v57  ;;  %1570 = vmatpush3.bf16.msra.mxu1 %v2099_v56 }
 0x13c   :  { %1627 = vmatprep.subr.bf16.mxu0 %v1904_v0  ;;  %1596 = vmatprep.subr.bf16.mxu1 %v2112_v60 }
 0x1f1   :  { %v334_v35 = vpop.f32.mrb[0].mxu1  ;;  %v405_v37 = vpop.f32.mrb[2].mxu0 }
 0x1f2   :  { %v335_v38 = vadd.f32 %v2172_v34, %v334_v35  ;;  %v1763_v39 = vadd.f32 %v2118_v61, %v405_v37  ;;  %v1311_v40 = vpop.f32.mrb[1].mxu1  ;;  %v1346_v42 = vpop.f32.mrb[3].mxu0 }
 0x1f4   :  { %1787 = vtanh.f32 %v335_v38  ;;  %v1008_v38 = vld [vmem:[%s2297_s7] ss:$0 sm:$0xff] }
 0x1f5   :  { %1789 = vtanh.f32 %v1763_v39 }
 0x1fe   :  { %v1788_v44 = vpop.eup %1787 }
 0x1ff   :  { %v1790_v45 = vpop.eup %1789  ;;  %474 = vmatprep.mubr.f32.mxu1 %v1788_v44 }
 0x200   :  { %1380 = vmatmul.mubr.f32.vlgmr.msra.gmra.mrb[4].mxu0 %v1790_v45  ;;  %475 = vmatmul.mubr.f32.vlgmr.msra.gmra.mrb[2].mxu1 %v1790_v45 }
 0x201   :  { %1629 = vmatpush3.bf16.msra.mxu0 %v2023_v13  ;;  %1598 = vmatpush3.bf16.msra.mxu1 %v2018_v8 }
 0x202   :  { %1630 = vmatprep.subr.bf16.mxu0 %v1904_v0  ;;  %1600 = vmatprep.subr.bf16.mxu1 %v2121_v5 }
 0x203   :  { %1414 = vmatprep.mubr.msk.f32.mxu0 %vm1905_vm0, %v1906_v1 }
 0x205   :  { %1632 = vmatpush3.bf16.msra.mxu0 %v2032_v19  ;;  %1602 = vmatpush3.bf16.msra.mxu1 %v2027_v14 }
 0x206   :  { %1633 = vmatprep.subr.bf16.mxu0 %v1904_v0  ;;  %1604 = vmatprep.subr.bf16.mxu1 %v2127_v10 }
 0x209   :  { %1635 = vmatpush3.bf16.msra.mxu0 %v2046_v26  ;;  %1606 = vmatpush3.bf16.msra.mxu1 %v2041_v21 }
 0x20a   :  { %1636 = vmatprep.subr.bf16.mxu0 %v1904_v0  ;;  %1608 = vmatprep.subr.bf16.mxu1 %v2135_v15 }
 0x20d   :  { %1638 = vmatpush3.bf16.msra.mxu0 %v2056_v32  ;;  %1610 = vmatpush3.bf16.msra.mxu1 %v2052_v27 }
 0x20e   :  { %1639 = vmatprep.subr.bf16.mxu0 %v1904_v0  ;;  %1612 = vmatprep.subr.bf16.mxu1 %v2141_v18 }
 0x211   :  { %1641 = vmatpush3.bf16.msra.mxu0 %v2064_v36  ;;  %1614 = vmatpush3.bf16.msra.mxu1 %v2060_v33 }
 0x212   :  { %1642 = vmatprep.subr.bf16.mxu0 %v1904_v0  ;;  %1616 = vmatprep.subr.bf16.mxu1 %v2156_v23 }
 0x215   :  { %1644 = vmatpush3.bf16.msra.mxu0 %v2077_v43  ;;  %1618 = vmatpush3.bf16.msra.mxu1 %v2074_v41 }
 0x216   :  { %1645 = vmatprep.subr.bf16.mxu0 %v1904_v0  ;;  %1620 = vmatprep.subr.bf16.mxu1 %v2160_v29 }
 0x219   :  { %1647 = vmatpush3.bf16.msra.mxu0 %v2090_v50  ;;  %1622 = vmatpush3.bf16.msra.mxu1 %v2087_v47 }
 0x21a   :  { %1648 = vmatprep.subr.bf16.mxu0 %v1904_v0  ;;  %1624 = vmatprep.subr.bf16.mxu1 %v2162_v31 }
 0x21d   :  { %1650 = vmatpush3.bf16.msra.mxu0 %v2103_v57  ;;  %1626 = vmatpush3.bf16.msra.mxu1 %v2099_v56 }
 0x21e   :  { %1683 = vmatprep.subr.bf16.mxu0 %v1904_v0  ;;  %1652 = vmatprep.subr.bf16.mxu1 %v2112_v60 }
 0x2d3   :  { %v547_v46 = vpop.f32.mrb[4].mxu0  ;;  %v1082_v48 = vpop.f32.mrb[2].mxu1 }
 0x2d4   :  { %v1764_v49 = vadd.f32 %v2118_v61, %v547_v46  ;;  %v1381_v51 = vpop.f32.mrb[5].mxu0  ;;  %v1083_v52 = vpop.f32.mrb[3].mxu1 }
 0x2d5   :  { %v1084_v53 = vadd.f32 %v1083_v52, %v1082_v48 }
 0x2d6   :  { %1791 = vtanh.f32 %v1764_v49 }
 0x2d7   :  { %v477_v54 = vadd.f32 %v1084_v53, %v2172_v34 }
 0x2d9   :  { %1793 = vtanh.f32 %v477_v54 }
 0x2e0   :  { %v1792_v55 = vpop.eup %1791 }
 0x2e1   :  { %1415 = vmatmul.mubr.f32.vlgmr.msra.gmra.mrb[6].mxu0 %v1792_v55 }
 0x2e2   :  { %1685 = vmatpush3.bf16.msra.mxu0 %v2023_v13  ;;  %1449 = vmatprep.mubr.msk.f32.mxu0 %vm1905_vm0, %v1906_v1 }
 0x2e3   :  { %v1794_v58 = vpop.eup %1793  ;;  %1686 = vmatprep.subr.bf16.mxu0 %v1904_v0 }
 0x2e4   :  { %616 = vmatprep.mubr.f32.mxu1 %v1794_v58 }
 0x2e5   :  { %617 = vmatmul.mubr.f32.vlgmr.msra.gmra.mrb[4].mxu1 %v1792_v55 }
 0x2e6   :  { %1688 = vmatpush3.bf16.msra.mxu0 %v2032_v19  ;;  %1654 = vmatpush3.bf16.msra.mxu1 %v2018_v8 }
 0x2e7   :  { %1689 = vmatprep.subr.bf16.mxu0 %v1904_v0  ;;  %1656 = vmatprep.subr.bf16.mxu1 %v2121_v5 }
 0x2ea   :  { %1691 = vmatpush3.bf16.msra.mxu0 %v2046_v26  ;;  %1658 = vmatpush3.bf16.msra.mxu1 %v2027_v14 }
 0x2eb   :  { %1692 = vmatprep.subr.bf16.mxu0 %v1904_v0  ;;  %1660 = vmatprep.subr.bf16.mxu1 %v2127_v10 }
 0x2ee   :  { %1694 = vmatpush3.bf16.msra.mxu0 %v2056_v32  ;;  %1662 = vmatpush3.bf16.msra.mxu1 %v2041_v21 }
 0x2ef   :  { %1695 = vmatprep.subr.bf16.mxu0 %v1904_v0  ;;  %1664 = vmatprep.subr.bf16.mxu1 %v2135_v15 }
 0x2f2   :  { %1697 = vmatpush3.bf16.msra.mxu0 %v2064_v36  ;;  %1666 = vmatpush3.bf16.msra.mxu1 %v2052_v27 }
 0x2f3   :  { %1698 = vmatprep.subr.bf16.mxu0 %v1904_v0  ;;  %1668 = vmatprep.subr.bf16.mxu1 %v2141_v18 }
 0x2f6   :  { %1700 = vmatpush3.bf16.msra.mxu0 %v2077_v43  ;;  %1670 = vmatpush3.bf16.msra.mxu1 %v2060_v33 }
 0x2f7   :  { %1701 = vmatprep.subr.bf16.mxu0 %v1904_v0  ;;  %1672 = vmatprep.subr.bf16.mxu1 %v2156_v23 }
 0x2fa   :  { %1703 = vmatpush3.bf16.msra.mxu0 %v2090_v50  ;;  %1674 = vmatpush3.bf16.msra.mxu1 %v2074_v41 }
 0x2fb   :  { %1704 = vmatprep.subr.bf16.mxu0 %v1904_v0  ;;  %1676 = vmatprep.subr.bf16.mxu1 %v2160_v29 }
 0x2fe   :  { %1706 = vmatpush3.bf16.msra.mxu0 %v2103_v57  ;;  %1678 = vmatpush3.bf16.msra.mxu1 %v2087_v47 }
 0x2ff   :  { %1680 = vmatprep.subr.bf16.mxu1 %v2162_v31  ;;  %1739 = vmatprep.subr.bf16.mxu0 %v1904_v0 }
 0x302   :  { %1682 = vmatpush3.bf16.msra.mxu1 %v2099_v56 }
 0x303   :  { %1708 = vmatprep.subr.bf16.mxu1 %v2112_v60 }
 0x3b4   :  { %v689_v13 = vpop.f32.mrb[6].mxu0 }
 0x3b5   :  { %v1765_v19 = vadd.f32 %v2118_v61, %v689_v13  ;;  %v1416_v26 = vpop.f32.mrb[7].mxu0 }
 0x3b7   :  { %1795 = vtanh.f32 %v1765_v19 }
 0x3b8   :  { %v1134_v32 = vpop.f32.mrb[4].mxu1 }
 0x3b9   :  { %v1135_v36 = vpop.f32.mrb[5].mxu1 }
 0x3ba   :  { %v1136_v43 = vadd.f32 %v1135_v36, %v1134_v32 }
 0x3bc   :  { %v619_v50 = vadd.f32 %v1136_v43, %v2172_v34 }
 0x3be   :  { %1797 = vtanh.f32 %v619_v50 }
 0x3c1   :  { %v1796_v57 = vpop.eup %1795 }
 0x3c2   :  { %1450 = vmatmul.mubr.f32.vlgmr.msra.gmra.mrb[8].mxu0 %v1796_v57 }
 0x3c3   :  { %1484 = vmatprep.mubr.msk.f32.mxu0 %vm1905_vm0, %v1906_v1  ;;  %v128_v1 = vld [vmem:[#allocation7] sm:$0xff] }
 0x3c8   :  { %v1798_v59 = vpop.eup %1797 }
 0x3c9   :  { %758 = vmatprep.mubr.f32.mxu1 %v1798_v59 }
 0x3ca   :  { %759 = vmatmul.mubr.f32.vlgmr.msra.gmra.mrb[6].mxu1 %v1796_v57 }
 0x3cb   :  { %1710 = vmatpush3.bf16.msra.mxu1 %v2018_v8  ;;  %v129_v8 = vld [vmem:[#allocation7 + $0x8] sm:$0xff] }
 0x3cc   :  { %1712 = vmatprep.subr.bf16.mxu1 %v2121_v5 }
 0x3cf   :  { %1714 = vmatpush3.bf16.msra.mxu1 %v2027_v14  ;;  %v130_v14 = vld [vmem:[#allocation7 + $0x10] sm:$0xff] }
 0x3d0   :  { %1716 = vmatprep.subr.bf16.mxu1 %v2127_v10 }
 0x3d3   :  { %1718 = vmatpush3.bf16.msra.mxu1 %v2041_v21  ;;  %v1740_v21 = vpack.c.bf16 %v129_v8, %v128_v1 }
 0x3d4   :  { %1720 = vmatprep.subr.bf16.mxu1 %v2135_v15  ;;  %v137_v15 = vld [vmem:[#allocation7 + $0x48] sm:$0xff] }
 0x3d5   :  { %1741 = vmatpush3.bf16.msra.mxu0 %v1740_v21  ;;  %v1752_v16 = vpack.c.bf16 %v137_v15, %v136_v12 }
 0x3d6   :  { %1742 = vmatprep.subr.bf16.mxu0 %v1904_v0 }
 0x3d7   :  { %1722 = vmatpush3.bf16.msra.mxu1 %v2052_v27  ;;  %v131_v27 = vld [vmem:[#allocation7 + $0x18] sm:$0xff] }
 0x3d8   :  { %1724 = vmatprep.subr.bf16.mxu1 %v2141_v18  ;;  %v1743_v60 = vpack.c.bf16 %v131_v27, %v130_v14  ;;  %v139_v18 = vld [vmem:[#allocation7 + $0x58] sm:$0xff] }
 0x3d9   :  { %v1755_v20 = vpack.c.bf16 %v139_v18, %v138_v17 }
 0x3da   :  { %1744 = vmatpush3.bf16.msra.mxu0 %v1743_v60 }
 0x3db   :  { %1726 = vmatpush3.bf16.msra.mxu1 %v2060_v33  ;;  %v132_v33 = vld [vmem:[#allocation7 + $0x20] sm:$0xff]  ;;  %1745 = vmatprep.subr.bf16.mxu0 %v1904_v0 }
 0x3dc   :  { %1728 = vmatprep.subr.bf16.mxu1 %v2156_v23  ;;  %v141_v23 = vld [vmem:[#allocation7 + $0x68] sm:$0xff] }
 0x3df   :  { %1730 = vmatpush3.bf16.msra.mxu1 %v2074_v41  ;;  %v1746_v41 = vpack.c.bf16 %v133_v62, %v132_v33 }
 0x3e0   :  { %1732 = vmatprep.subr.bf16.mxu1 %v2160_v29 }
 0x3e1   :  { %1747 = vmatpush3.bf16.msra.mxu0 %v1746_v41 }
 0x3e2   :  { %1748 = vmatprep.subr.bf16.mxu0 %v1904_v0 }
 0x3e3   :  { %1734 = vmatpush3.bf16.msra.mxu1 %v2087_v47  ;;  %v134_v47 = vld [vmem:[#allocation7 + $0x30] sm:$0xff] }
 0x3e4   :  { %1736 = vmatprep.subr.bf16.mxu1 %v2162_v31  ;;  %v1749_v2 = vpack.c.bf16 %v135_v63, %v134_v47 }
 0x3e6   :  { %1750 = vmatpush3.bf16.msra.mxu0 %v1749_v2 }
 0x3e7   :  { %1738 = vmatpush3.bf16.msra.mxu1 %v2099_v56  ;;  %1751 = vmatprep.subr.bf16.mxu0 %v1904_v0 }
 0x3ea   :  { %1753 = vmatpush3.bf16.msra.mxu0 %v1752_v16 }
 0x3eb   :  { %1754 = vmatprep.subr.bf16.mxu0 %v1904_v0 }
 0x3ee   :  { %1756 = vmatpush3.bf16.msra.mxu0 %v1755_v20 }
 0x3ef   :  { %1757 = vmatprep.subr.bf16.mxu0 %v1904_v0 }
 0x495   :  { %v831_v56 = vpop.f32.mrb[8].mxu0 }
 0x496   :  { %v1451_v3 = vpop.f32.mrb[9].mxu0  ;;  %v1766_v7 = vadd.f32 %v2118_v61, %v831_v56  ;;  %v1758_v61 = vpack.c.bf16 %v141_v23, %v140_v22 }
 0x498   :  { %1759 = vmatpush3.bf16.msra.mxu0 %v1758_v61 }
 0x499   :  { %1760 = vmatprep.subr.bf16.mxu0 %v1904_v0 }
 0x49c   :  { %1762 = vmatpush3.bf16.msra.mxu0 %v1761_v28 }
 0x49d   :  { %v1186_v4 = vpop.f32.mrb[6].mxu1 }
 0x49e   :  { %v1187_v5 = vpop.f32.mrb[7].mxu1 }
 0x49f   :  { %v1188_v6 = vadd.f32 %v1187_v5, %v1186_v4 }
 0x4a1   :  { %v761_v9 = vadd.f32 %v1188_v6, %v2172_v34 }
 0x4a3   :  { %1799 = vtanh.f32 %v761_v9 }
 0x4a4   :  { %1801 = vtanh.f32 %v1766_v7 }
 0x4ad   :  { %v1800_v10 = vpop.eup %1799 }
 0x4ae   :  { %v1802_v11 = vpop.eup %1801  ;;  %900 = vmatprep.mubr.f32.mxu1 %v1800_v10 }
 0x4af   :  { %901 = vmatmul.mubr.f32.vlgmr.msra.gmra.mrb[8].mxu1 %v1802_v11 }
 0x582   :  { %v1238_v29 = vpop.f32.mrb[8].mxu1 }
 0x583   :  { %v1239_v30 = vpop.f32.mrb[9].mxu1 }
 0x584   :  { %v1240_v31 = vadd.f32 %v1239_v30, %v1238_v29 }
 0x586   :  { %v903_v35 = vadd.f32 %v1240_v31, %v2172_v34 }
 0x588   :  { %1803 = vtanh.f32 %v903_v35 }
 0x592   :  { %v1804_v37 = vpop.eup %1803 }
 0x593   :  { %1485 = vmatmul.mubr.f32.vlgmr.msra.gmra.mrb[10].mxu0 %v1804_v37 }
 0x666   :  { %v979_v39 = vpop.f32.mrb[10].mxu0 }
 0x667   :  { %v980_v40 = vadd.f32 %v1008_v38, %v979_v39  ;;  %v1486_v42 = vpop.f32.mrb[11].mxu0 }
 0x669   :  { %983 = vst [vmem:[#allocation8] sm:$0xff] %v980_v40 }
 0x66a   :  { %1882 = shalt.err (!%p1879_p0)
}
 0x66b   :  { %s1883_s19 = scalar_lea.hbm %s2298_s8, 128 }
 0x66c   :  { %p1884_p1 = scmp.ne.s32.totalorder %s2298_s8, %s1883_s19  ;;  %p1887_p2 = scmp.lt.u32.totalorder %s1883_s19, %s2298_s8 }
 0x66e   :  { %p1889_p3 = pnand %p1887_p2, %p1884_p1 }
 0x670   :  { %1892 = shalt.err (!%p1889_p3)
}
 0x671   :  { %993 = dma.vmem_to_hbm [thread:$0]  %s991_s13, 128, %s2298_s8, [#allocation4]  }
 0x672   :  { %1897 = dma.done.wait [#allocation4], 128  }
 0x673   :  { %1898 = vsyncadd [#allocation4], 4294967168 }
 0x674   :  { %997 = vsyncpa [#allocation3], 1 }
 0x675   :  { %998 = vsyncpa [#allocation6], 1 }
 0x676   :  { %999 = vsyncpa [#allocation4], 1 }

</bundles_post_ra>
